<compile_context>
chip_gen: v6e
topology: v6e:2x2x1
jax: 0.10.0
libtpu: 0.0.40
codegen_flags: <defaults>
</compile_context>

<pallas_src>
import functools
import math

import jax
import jax.numpy as jnp
from jax.experimental import pallas as pl
from jax.experimental.pallas import tpu as pltpu


# ---------------------------------------------------------------------------
# Generation-aware tiling / VMEM-limit parameters
# ---------------------------------------------------------------------------
@functools.lru_cache(maxsize=1)
def _gen_params():
    vmem_cap = 64 * 1024 * 1024
    try:
        vmem_cap = int(pltpu.get_tpu_info().vmem_capacity_bytes)
    except Exception:
        pass  # query unavailable -> conservative (v7x-safe) defaults below
    if vmem_cap >= 96 * 1024 * 1024:
        # v5e / v6e: 128 MiB physical VMEM -> big tiles, generous scoped limit.
        # TODO(synk): on v5e, if profiles show the single EUP saturating on exp(),
        # drop kv_tile to 256 (v5e/v6e cannot be told apart by VMEM size alone).
        return {"vmem_limit": 64 * 1024 * 1024,
                "tm": 512, "tn": 512, "tk": 1024,
                "q_tile": 256, "kv_tile": 1024, "seq_tile": 1024}
    # v7x: 64 MiB physical VMEM -> bounded tiles, conservative limit with headroom.
    return {"vmem_limit": 48 * 1024 * 1024,
            "tm": 256, "tn": 256, "tk": 512,
            "q_tile": 256, "kv_tile": 512, "seq_tile": 512}


def _pick_tile(dim, target, *, align):
    """Largest `align`-multiple <= target that divides dim (or the full dim)."""
    if dim <= target:
        return dim
    t = (target // align) * align
    while t >= align:
        if dim % t == 0:
            return t
        t -= align
    if dim <= 4 * target:
        # No aligned divisor, but a single full-extent block is still modest.
        return dim
    # TODO(synk): add a cdiv grid + masked epilogue for pathological shapes.
    raise ValueError(f"dim={dim} has no {align}-aligned tile <= {target}; pad the input.")


def _head_blocking(n_heads, head_dim):
    """Heads per block so the lane (last) block width hb*head_dim is 128-packable."""
    if head_dim % 128 == 0:
        return 1
    if 128 % head_dim == 0 and n_heads % (128 // head_dim) == 0:
        return 128 // head_dim
    for hb in range(2, n_heads):
        if n_heads % hb == 0 and (hb * head_dim) % 128 == 0:
            return hb
    # TODO(synk): pad head_dim to a lane-packable size instead of bw == dim.
    return n_heads


# ---------------------------------------------------------------------------
# Tiled linear (no bias):  y = x @ W,  W stored as [in, out]
# ---------------------------------------------------------------------------
def _matmul_kernel(x_ref, w_ref, o_ref, acc_ref):
    @pl.when(pl.program_id(2) == 0)
    def _init():
        acc_ref[...] = jnp.zeros_like(acc_ref)

    # Native-dtype operands, f32 accumulation on the MXU.
    acc_ref[...] += jnp.dot(x_ref[...], w_ref[...],
                            preferred_element_type=jnp.float32)

    @pl.when(pl.program_id(2) == pl.num_programs(2) - 1)
    def _store():
        o_ref[...] = acc_ref[...].astype(o_ref.dtype)


def linear_pallas(x, w, params):
    M, K = x.shape
    K2, N = w.shape
    assert K == K2
    tm = _pick_tile(M, params["tm"], align=8)
    tn = _pick_tile(N, params["tn"], align=128)
    tk = _pick_tile(K, params["tk"], align=128)
    grid = (M // tm, N // tn, K // tk)
    return pl.pallas_call(
        _matmul_kernel,
        out_shape=jax.ShapeDtypeStruct((M, N), x.dtype),
        grid_spec=pltpu.PrefetchScalarGridSpec(
            num_scalar_prefetch=0,
            grid=grid,
            in_specs=[
                pl.BlockSpec((tm, tk), lambda i, j, k: (i, k)),
                pl.BlockSpec((tk, tn), lambda i, j, k: (k, j)),
            ],
            out_specs=pl.BlockSpec((tm, tn), lambda i, j, k: (i, j)),
            scratch_shapes=[pltpu.VMEM((tm, tn), jnp.float32)],
        ),
        compiler_params=pltpu.CompilerParams(
            dimension_semantics=("parallel", "parallel", "arbitrary"),
            vmem_limit_bytes=params["vmem_limit"],
        ),
    )(x, w)


# ---------------------------------------------------------------------------
# One-shot rotary on K (reads the K half of the fused [B, m_seq, 2*dim] slab)
# ---------------------------------------------------------------------------
def _rotary_k_kernel(k_ref, cos_ref, sin_ref, o_ref, *, hb, hd):
    cos = cos_ref[...]          # [ts, hd]
    sin = sin_ref[...]          # [ts, hd], rotate_half sign already folded in
    for i in range(hb):         # static unrolled loop over heads in this block
        sl = slice(i * hd, (i + 1) * hd)
        k = k_ref[:, sl]
        # k*cos + rotate_half(k)*sin   (roll -> XLU slot, +/-1 sign lives in sin)
        o_ref[:, sl] = k * cos + pltpu.roll(k, shift=hd // 2, axis=1) * sin


def rotary_k_pallas(kv, cos, sin, *, n_heads, params):
    """kv: [B, m_seq, 2*dim] fused slab (K columns first). Returns rotated K [B, m_seq, dim]."""
    B, m_seq, two_dim = kv.shape
    dim = two_dim // 2
    assert dim % n_heads == 0
    hd = dim // n_heads
    hb = _head_blocking(n_heads, hd)
    nhb = n_heads // hb
    bw = hb * hd

    ts = _pick_tile(m_seq, params["seq_tile"], align=8)
    ns = m_seq // ts

    cos2 = cos.reshape(m_seq, hd).astype(kv.dtype)
    sign = jnp.concatenate([-jnp.ones((hd // 2,), kv.dtype),
                            jnp.ones((hd // 2,), kv.dtype)])
    sin2 = sin.reshape(m_seq, hd).astype(kv.dtype) * sign

    kernel = functools.partial(_rotary_k_kernel, hb=hb, hd=hd)
    return pl.pallas_call(
        kernel,
        out_shape=jax.ShapeDtypeStruct((B, m_seq, dim), kv.dtype),
        grid_spec=pltpu.PrefetchScalarGridSpec(
            num_scalar_prefetch=0,
            grid=(B, nhb, ns),
            in_specs=[
                # K columns of the fused kv slab
                pl.BlockSpec((None, ts, bw), lambda b, h, s: (b, s, h)),
                pl.BlockSpec((ts, hd), lambda b, h, s: (s, 0)),
                pl.BlockSpec((ts, hd), lambda b, h, s: (s, 0)),
            ],
            out_specs=pl.BlockSpec((None, ts, bw), lambda b, h, s: (b, s, h)),
        ),
        compiler_params=pltpu.CompilerParams(
            dimension_semantics=("parallel", "parallel", "parallel"),
            vmem_limit_bytes=params["vmem_limit"],
        ),
    )(kv, cos2, sin2)


# ---------------------------------------------------------------------------
# Flash-style attention over pre-rotated K and the V half of the fused kv slab.
# Grid = (B, head_blocks, q_tiles, kv_tiles); kv axis last, "arbitrary".
# ---------------------------------------------------------------------------
def _attn_kernel(q_ref, k_ref, v_ref, o_ref, acc_scr, m_scr, l_scr, *, hb, hd):
    ki = pl.program_id(3)

    @pl.when(ki == 0)
    def _init():
        m_scr[...] = jnp.full_like(m_scr, -jnp.inf)
        l_scr[...] = jnp.zeros_like(l_scr)
        acc_scr[...] = jnp.zeros_like(acc_scr)

    for i in range(hb):          # static unrolled loop over heads in this block
        sl = slice(i * hd, (i + 1) * hd)
        q = q_ref[:, sl]         # 1/sqrt(head_dim) already folded into Wq
        k = k_ref[:, sl]         # rotary already applied
        v = v_ref[:, sl]

        # scores [tq, kv_tile]; f32 MXU accumulation, no operand upcast.
        # TODO(synk): if the Mosaic dump shows an XLU transpose of the K tile here,
        # emit K pre-transposed per head from the rotary pass instead.
        s = jax.lax.dot_general(q, k, (((1,), (1,)), ((), ())),
                                preferred_element_type=jnp.float32)

        m_prev = m_scr[:, i:i + 1]
        l_prev = l_scr[:, i:i + 1]
        m_new = jnp.maximum(m_prev, jnp.max(s, axis=-1, keepdims=True))
        alpha = jnp.exp(m_prev - m_new)
        p = jnp.exp(s - m_new)
        l_scr[:, i:i + 1] = alpha * l_prev + jnp.sum(p, axis=-1, keepdims=True)
        m_scr[:, i:i + 1] = m_new
        acc_scr[:, sl] = alpha * acc_scr[:, sl] + jnp.dot(
            p.astype(v.dtype), v, preferred_element_type=jnp.float32)

    @pl.when(ki == pl.num_programs(3) - 1)
    def _finalize():
        for i in range(hb):
            sl = slice(i * hd, (i + 1) * hd)
            # exact division: runs once per (b, head-block, q-tile); approx buys nothing
            o_ref[:, sl] = (acc_scr[:, sl] / l_scr[:, i:i + 1]).astype(o_ref.dtype)


def flash_attention_pallas(q, k_rot, kv, *, n_heads, params):
    """q: [B,p_seq,dim]; k_rot: [B,m_seq,dim] (pre-rotated); kv: [B,m_seq,2*dim]
    (V = columns dim:2*dim). Returns [B, p_seq, dim]."""
    B, p_seq, dim = q.shape
    _, m_seq, two_dim = kv.shape
    assert two_dim == 2 * dim and dim % n_heads == 0
    hd = dim // n_heads
    hb = _head_blocking(n_heads, hd)
    nhb = n_heads // hb
    bw = hb * hd

    tq = _pick_tile(p_seq, params["q_tile"], align=8)
    nq = p_seq // tq
    kv_tile = _pick_tile(m_seq, params["kv_tile"], align=8)
    nkv = m_seq // kv_tile

    kernel = functools.partial(_attn_kernel, hb=hb, hd=hd)
    return pl.pallas_call(
        kernel,
        out_shape=jax.ShapeDtypeStruct((B, p_seq, dim), q.dtype),
        grid_spec=pltpu.PrefetchScalarGridSpec(
            num_scalar_prefetch=0,
            grid=(B, nhb, nq, nkv),
            in_specs=[
                # q tile: resident across kv steps
                pl.BlockSpec((None, tq, bw), lambda b, h, qi, ki: (b, qi, h)),
                # pre-rotated K
                pl.BlockSpec((None, kv_tile, bw), lambda b, h, qi, ki: (b, ki, h)),
                # V columns of the fused kv slab (offset by nhb head-blocks == dim cols)
                pl.BlockSpec((None, kv_tile, bw), lambda b, h, qi, ki: (b, ki, h + nhb)),
            ],
            out_specs=pl.BlockSpec((None, tq, bw), lambda b, h, qi, ki: (b, qi, h)),
            scratch_shapes=[
                pltpu.VMEM((tq, bw), jnp.float32),   # acc
                pltpu.VMEM((tq, hb), jnp.float32),   # running max m
                pltpu.VMEM((tq, hb), jnp.float32),   # running sum l
            ],
        ),
        compiler_params=pltpu.CompilerParams(
            dimension_semantics=("parallel", "parallel", "parallel", "arbitrary"),
            vmem_limit_bytes=params["vmem_limit"],
        ),
    )(q, k_rot, kv)


# ---------------------------------------------------------------------------
# Attention module (JAX wrapper around the Pallas kernels)
# ---------------------------------------------------------------------------
class AttentionPallas:
    def __init__(self, dim, n_heads, key, dtype=jnp.float32):
        assert dim % n_heads == 0
        self.dim = dim
        self.n_heads = n_heads
        self.head_dim = dim // n_heads
        self.dtype = dtype
        k1, k2, k3, k4 = jax.random.split(key, 4)
        init = lambda k: (jax.random.normal(k, (dim, dim), jnp.float32) * 0.02).astype(dtype)
        # weights stored as [in, out] (= transpose of torch nn.Linear weight)
        self.wq = init(k1)
        self.wk = init(k2)
        self.wv = init(k3)
        self.wo = init(k4)
        # 1/sqrt(head_dim) folded into Wq once at init (zero runtime cost).
        scale = 1.0 / math.sqrt(self.head_dim)
        self.wq_scaled = (self.wq.astype(jnp.float32) * scale).astype(dtype)
        # fused K/V projection weight: one matmul, model states read from HBM once
        self.wkv = jnp.concatenate([self.wk, self.wv], axis=1)   # [dim, 2*dim]

    def __call__(self, peft_hidden_states, model_hidden_states, cos, sin,
                 attention_mask=None):
        # TODO(synk): attention_mask != None path (additive SDPA mask) not implemented.
        params = _gen_params()
        B, p_seq, dim = peft_hidden_states.shape
        _, m_seq, _ = model_hidden_states.shape

        # Projections (tiled Pallas matmuls; K and V fused, scale folded into Wq).
        q = linear_pallas(peft_hidden_states.reshape(B * p_seq, dim), self.wq_scaled, params)
        kv = linear_pallas(model_hidden_states.reshape(B * m_seq, dim), self.wkv, params)

        # Keep slab layouts — pure metadata reshapes, no HBM transposes.
        q = q.reshape(B, p_seq, dim)
        kv = kv.reshape(B, m_seq, 2 * dim)

        # Rotary applied to K exactly once (cos/sin never enter the attention loop).
        k_rot = rotary_k_pallas(kv, cos, sin, n_heads=self.n_heads, params=params)

        attn = flash_attention_pallas(q, k_rot, kv, n_heads=self.n_heads, params=params)

        out = linear_pallas(attn.reshape(B * p_seq, dim), self.wo, params).reshape(B, p_seq, dim)
        return {"attn_output": out}


def make_rotary(m_seq, head_dim, dtype=jnp.float32):
    inv_freq = 1.0 / (10000.0 ** (jnp.arange(0, head_dim, 2, dtype=jnp.float32) / head_dim))
    t = jnp.arange(m_seq, dtype=jnp.float32)
    freqs = jnp.einsum("i,j->ij", t, inv_freq)                 # [m_seq, hd/2]
    emb = jnp.concatenate([freqs, freqs], axis=-1)             # [m_seq, hd]
    cos = jnp.cos(emb)[None, None].astype(dtype)               # [1,1,m_seq,hd]
    sin = jnp.sin(emb)[None, None].astype(dtype)
    return cos, sin


# ---------------------------------------------------------------------------
# Pure-JAX reference (mirrors the PyTorch module exactly) for correctness check
# ---------------------------------------------------------------------------
def attention_reference(peft, model, cos, sin, wq, wk, wv, wo, n_heads):
    B, p_seq, dim = peft.shape
    _, m_seq, _ = model.shape
    hd = dim // n_heads
    f32 = jnp.float32
    q = (peft.astype(f32) @ wq.astype(f32)).reshape(B, p_seq, n_heads, hd).transpose(0, 2, 1, 3)
    k = (model.astype(f32) @ wk.astype(f32)).reshape(B, m_seq, n_heads, hd).transpose(0, 2, 1, 3)
    v = (model.astype(f32) @ wv.astype(f32)).reshape(B, m_seq, n_heads, hd).transpose(0, 2, 1, 3)
    c = cos.reshape(m_seq, hd).astype(f32)
    s = sin.reshape(m_seq, hd).astype(f32)
    k_rot = jnp.concatenate([-k[..., hd // 2:], k[..., :hd // 2]], axis=-1)
    k = k * c + k_rot * s
    scores = jnp.einsum("bhqd,bhkd->bhqk", q, k) / math.sqrt(hd)
    p = jax.nn.softmax(scores, axis=-1)
    o = jnp.einsum("bhqk,bhkd->bhqd", p, v)
    o = o.transpose(0, 2, 1, 3).reshape(B, p_seq, dim)
    return o @ wo.astype(f32)


if __name__ == "__main__":
    B = 2
    dim = 256
    n_heads = 2            # head_dim = 128 -> fully lane-dense blocks
    head_dim = dim // n_heads
    p_seq = 8
    m_seq = 8

    root = jax.random.PRNGKey(0)
    k_params, k_peft, k_model = jax.random.split(root, 3)

    attn_mod = AttentionPallas(dim, n_heads, k_params, dtype=jnp.float32)

    peft_hidden_states = jax.random.normal(k_peft, (B, p_seq, dim), jnp.float32)
    model_hidden_states = jax.random.normal(k_model, (B, m_seq, dim), jnp.float32)
    cos, sin = make_rotary(m_seq, head_dim)

    out = attn_mod(peft_hidden_states, model_hidden_states, cos, sin)
    attn_output = jax.block_until_ready(out["attn_output"])
    assert attn_output.shape == (B, p_seq, dim)
    assert not bool(jnp.any(jnp.isnan(attn_output)))  # check_nan equivalent

    ref = attention_reference(peft_hidden_states, model_hidden_states, cos, sin,
                              attn_mod.wq, attn_mod.wk, attn_mod.wv, attn_mod.wo,
                              n_heads)
    max_err = float(jnp.max(jnp.abs(attn_output.astype(jnp.float32) - ref)))
    # tolerance covers MXU-vs-XLA f32 matmul precision differences only
    assert bool(jnp.allclose(attn_output.astype(jnp.float32), ref,
                             rtol=2e-2, atol=5e-3)), max_err
    print("KERNEL_OK")
</pallas_src>

<mosaic_0001>
module attributes {stable_mosaic.version = 11 : i64} {
  func.func @_matmul_kernel(%arg0: i32, %arg1: i32, %arg2: i32, %arg3: memref<16x256xf32, #tpu.memory_space<vmem>>, %arg4: memref<256x256xf32, #tpu.memory_space<vmem>>, %arg5: memref<16x256xf32, #tpu.memory_space<vmem>>, %arg6: memref<16x256xf32, #tpu.memory_space<vmem>>) attributes {dimension_semantics = [#tpu.dimension_semantics<parallel>, #tpu.dimension_semantics<parallel>, #tpu.dimension_semantics<arbitrary>], iteration_bounds = array<i64: 1, 1, 1>, scalar_prefetch = 0 : i64, scratch_operands = 1 : i64, tpu.core_type = #tpu.core_type<tc>, window_params = [{transform_indices = @transform_0, window_bounds = array<i64: 16, 256>}, {transform_indices = @transform_1, window_bounds = array<i64: 256, 256>}, {transform_indices = @transform_2, window_bounds = array<i64: 16, 256>}]} {
    %c0_i32 = arith.constant 0 : i32
    %0 = arith.cmpi eq, %arg2, %c0_i32 : i32
    %1 = arith.extui %0 : i1 to i32
    %c0_i32_0 = arith.constant 0 : i32
    %2 = arith.cmpi ne, %1, %c0_i32_0 : i32
    scf.if %2 {
      %cst_10 = arith.constant 0.000000e+00 : f32
      %12 = vector.broadcast %cst_10 : f32 to vector<16x256xf32>
      %c0_11 = arith.constant 0 : index
      %c0_12 = arith.constant 0 : index
      %13 = vector.load %arg6[%c0_11, %c0_12] : memref<16x256xf32, #tpu.memory_space<vmem>>, vector<16x256xf32>
      tpu.vector_store %arg6[%c0_11, %c0_12], %12 {strides = array<i32>} : memref<16x256xf32, #tpu.memory_space<vmem>>, vector<16x256xf32>,
    } else {
    }
    %c0 = arith.constant 0 : index
    %c0_1 = arith.constant 0 : index
    %3 = vector.load %arg6[%c0, %c0_1] : memref<16x256xf32, #tpu.memory_space<vmem>>, vector<16x256xf32>
    %c0_2 = arith.constant 0 : index
    %c0_3 = arith.constant 0 : index
    %4 = vector.load %arg3[%c0_2, %c0_3] : memref<16x256xf32, #tpu.memory_space<vmem>>, vector<16x256xf32>
    %c0_4 = arith.constant 0 : index
    %c0_5 = arith.constant 0 : index
    %5 = vector.load %arg4[%c0_4, %c0_5] : memref<256x256xf32, #tpu.memory_space<vmem>>, vector<256x256xf32>
    %cst = arith.constant dense<0.000000e+00> : vector<16x256xf32>
    %6 = tpu.matmul %4, %5, %cst {dimension_numbers = #tpu.dot_dimension_numbers<[1], [0], [0], [1], [0, 0, 1, 1], [], []>} : vector<16x256xf32>, vector<256x256xf32>, vector<16x256xf32> -> vector<16x256xf32>
    %7 = arith.addf %3, %6 : vector<16x256xf32>
    %c0_6 = arith.constant 0 : index
    %c0_7 = arith.constant 0 : index
    %8 = vector.load %arg6[%c0_6, %c0_7] : memref<16x256xf32, #tpu.memory_space<vmem>>, vector<16x256xf32>
    tpu.vector_store %arg6[%c0_6, %c0_7], %7 {strides = array<i32>} : memref<16x256xf32, #tpu.memory_space<vmem>>, vector<16x256xf32>,
    %c0_i32_8 = arith.constant 0 : i32
    %9 = arith.cmpi eq, %arg2, %c0_i32_8 : i32
    %10 = arith.extui %9 : i1 to i32
    %c0_i32_9 = arith.constant 0 : i32
    %11 = arith.cmpi ne, %10, %c0_i32_9 : i32
    scf.if %11 {
      %c0_10 = arith.constant 0 : index
      %c0_11 = arith.constant 0 : index
      %12 = vector.load %arg6[%c0_10, %c0_11] : memref<16x256xf32, #tpu.memory_space<vmem>>, vector<16x256xf32>
      %c0_12 = arith.constant 0 : index
      %c0_13 = arith.constant 0 : index
      %13 = vector.load %arg5[%c0_12, %c0_13] : memref<16x256xf32, #tpu.memory_space<vmem>>, vector<16x256xf32>
      tpu.vector_store %arg5[%c0_12, %c0_13], %12 {strides = array<i32>} : memref<16x256xf32, #tpu.memory_space<vmem>>, vector<16x256xf32>,
    } else {
    }
    return
  }
  func.func @transform_0(%arg0: i32, %arg1: i32, %arg2: i32) -> (i32, i32) {
    %c0_i32 = arith.constant 0 : i32
    return %arg0, %arg2 : i32, i32
  }
  func.func @transform_1(%arg0: i32, %arg1: i32, %arg2: i32) -> (i32, i32) {
    %c0_i32 = arith.constant 0 : i32
    return %arg2, %arg1 : i32, i32
  }
  func.func @transform_2(%arg0: i32, %arg1: i32, %arg2: i32) -> (i32, i32) {
    %c0_i32 = arith.constant 0 : i32
    return %arg0, %arg1 : i32, i32
  }
}

</mosaic_0001>

<bundles_post_ra>
// kernel: tpu_custom_call.1
= control target key start
LH: loop header
LB: loop body
LE: loop exit
PB: predicated region body
PF: predicated region fallthrough
CT: control target
= control target key end

     0   :  { %7 = vsyncpa [#allocation4], 0  ;;  %s407_s0 = inlined_call_operand.hbm [shape: f32[16,256], index: 0, kind: input, shape index: {}]   ;;  %s408_s1 = inlined_call_operand.hbm [shape: f32[256,256], index: 1, kind: input, shape index: {}]   ;;  %s409_s2 = inlined_call_operand.hbm [shape: f32[16,256], index: 2, kind: output, shape index: {}]  }
   0x1   :  { %8 = vsyncpa [#allocation7], 0 }
   0x2   :  { %9 = vsyncpa [#allocation5], 0  ;;  %s369_s9 = smov [#allocation3]  }
   0x3   :  { %s15_s10 = sshll.u32 %s369_s9, 4  ;;  %s16_s10 = int_to_ptr.vmem [resolvable:$true] %s15_s10 }
   0x4   :  { %s311_s11 = scalar_lea.vmem %s16_s10, 512  ;;  %p316_p1 = scmp.lt.s32.totalorder %s16_s10, %s16_s10 }
   0x5   :  { %p312_p0 = scmp.ne.s32.totalorder %s16_s10, %s311_s11  ;;  %p317_p2 = scmp.lt.s32.totalorder %s311_s11, %s311_s11 }
   0x7   :  { %p318_p3 = por %p317_p2, %p316_p1 }
   0x9   :  { %p319_p4 = pnand %p318_p3, %p312_p0 }
   0xb   :  { %322 = shalt.err (!%p319_p4)
}
   0xc   :  { %s370_s12 = smov 256   ;;  %s371_s13 = smov 16  }
   0xd   :  { %21 = dma.hbm_to_vmem [thread:$0]  %s407_s0, 512, %s16_s10, [#allocation4], %s370_s12, %s370_s12, %s371_s13  }
   0xe   :  { %s372_s16 = smov [#allocation6]  }
   0xf   :  { %s27_s17 = sshll.u32 %s372_s16, 4  ;;  %s28_s17 = int_to_ptr.vmem [resolvable:$true] %s27_s17 }
  0x10   :  { %s331_s18 = scalar_lea.vmem %s28_s17, 8192  ;;  %p336_p6 = scmp.lt.s32.totalorder %s28_s17, %s28_s17 }
  0x11   :  { %p332_p5 = scmp.ne.s32.totalorder %s28_s17, %s331_s18  ;;  %p337_p7 = scmp.lt.s32.totalorder %s331_s18, %s331_s18 }
  0x13   :  { %p338_p8 = por %p337_p7, %p336_p6 }
  0x15   :  { %p339_p9 = pnand %p338_p8, %p332_p5 }
  0x17   :  { %342 = shalt.err (!%p339_p9)
}
  0x18   :  { %33 = dma.hbm_to_vmem [thread:$0]  %s408_s1, 8192, %s28_s17, [#allocation7], %s370_s12, %s370_s12, %s371_s13  }
  0x19   :  { %363 = dma.done.wait [#allocation4], 512  }
  0x1a   :  { %364 = vsyncadd [#allocation4], 4294966784 }
  0x1b   :  { %365 = dma.done.wait [#allocation7], 8192  }
  0x1c   :  { %366 = vsyncadd [#allocation7], 4294959104  ;;  %v87_v0 = vld [vmem:[#allocation6 + $0xf8] sm:$0xff]  ;;  %v86_v1 = vld [vmem:[#allocation6 + $0xf0] sm:$0xff]  ;;  %s373_s0 = smov [#allocation8]  }
  0x1d   :  { %v85_v2 = vld [vmem:[#allocation6 + $0xe8] sm:$0xff]  ;;  %120 = vmatprep.subr.mxu0 %v87_v0  ;;  %234 = vmatprep.subr.mxu1 %v87_v0  ;;  %v84_v3 = vld [vmem:[#allocation6 + $0xe0] sm:$0xff]  ;;  %v83_v4 = vld [vmem:[#allocation6 + $0xd8] sm:$0xff]  ;;  %s221_s1 = sshll.u32 %s373_s0, 4  ;;  %s222_s1 = int_to_ptr.vmem [resolvable:$true] %s221_s1 }
  0x1e   :  { %121 = vmatpush1.msra.mxu0 %v86_v1  ;;  %266 = vmatpush1.msra.mxu1 %v86_v1  ;;  %v82_v5 = vld [vmem:[#allocation6 + $0xd0] sm:$0xff]  ;;  %v81_v6 = vld [vmem:[#allocation6 + $0xc8] sm:$0xff]  ;;  %v80_v7 = vld [vmem:[#allocation6 + $0xc0] sm:$0xff]  ;;  %s343_s21 = scalar_lea.vmem %s222_s1, 512  ;;  %p348_p11 = scmp.lt.s32.totalorder %s222_s1, %s222_s1 }
  0x1f   :  { %122 = vmatprep.subr.mxu0 %v85_v2  ;;  %235 = vmatprep.subr.mxu1 %v85_v2  ;;  %v79_v8 = vld [vmem:[#allocation6 + $0xb8] sm:$0xff]  ;;  %v78_v9 = vld [vmem:[#allocation6 + $0xb0] sm:$0xff]  ;;  %v77_v10 = vld [vmem:[#allocation6 + $0xa8] sm:$0xff]  ;;  %p344_p10 = scmp.ne.s32.totalorder %s222_s1, %s343_s21  ;;  %p349_p12 = scmp.lt.s32.totalorder %s343_s21, %s343_s21 }
  0x20   :  { %123 = vmatpush1.msra.mxu0 %v84_v3  ;;  %267 = vmatpush1.msra.mxu1 %v84_v3  ;;  %v76_v11 = vld [vmem:[#allocation6 + $0xa0] sm:$0xff]  ;;  %v75_v12 = vld [vmem:[#allocation6 + $0x98] sm:$0xff]  ;;  %v74_v13 = vld [vmem:[#allocation6 + $0x90] sm:$0xff] }
  0x21   :  { %124 = vmatprep.subr.mxu0 %v83_v4  ;;  %236 = vmatprep.subr.mxu1 %v83_v4  ;;  %v73_v14 = vld [vmem:[#allocation6 + $0x88] sm:$0xff]  ;;  %v72_v15 = vld [vmem:[#allocation6 + $0x80] sm:$0xff]  ;;  %v71_v16 = vld [vmem:[#allocation6 + $0x78] sm:$0xff]  ;;  %p350_p13 = por %p349_p12, %p348_p11 }
  0x22   :  { %125 = vmatpush1.msra.mxu0 %v82_v5  ;;  %268 = vmatpush1.msra.mxu1 %v82_v5  ;;  %v70_v17 = vld [vmem:[#allocation6 + $0x70] sm:$0xff]  ;;  %v69_v18 = vld [vmem:[#allocation6 + $0x68] sm:$0xff]  ;;  %v68_v19 = vld [vmem:[#allocation6 + $0x60] sm:$0xff] }
  0x23   :  { %126 = vmatprep.subr.mxu0 %v81_v6  ;;  %237 = vmatprep.subr.mxu1 %v81_v6  ;;  %v67_v20 = vld [vmem:[#allocation6 + $0x58] sm:$0xff]  ;;  %v66_v21 = vld [vmem:[#allocation6 + $0x50] sm:$0xff]  ;;  %v65_v22 = vld [vmem:[#allocation6 + $0x48] sm:$0xff]  ;;  %p351_p0 = pnand %p350_p13, %p344_p10 }
  0x24   :  { %127 = vmatpush1.msra.mxu0 %v80_v7  ;;  %269 = vmatpush1.msra.mxu1 %v80_v7  ;;  %v64_v23 = vld [vmem:[#allocation6 + $0x40] sm:$0xff]  ;;  %v63_v24 = vld [vmem:[#allocation6 + $0x38] sm:$0xff]  ;;  %v62_v25 = vld [vmem:[#allocation6 + $0x30] sm:$0xff] }
  0x25   :  { %128 = vmatprep.subr.mxu0 %v79_v8  ;;  %238 = vmatprep.subr.mxu1 %v79_v8  ;;  %v61_v26 = vld [vmem:[#allocation6 + $0x28] sm:$0xff]  ;;  %v60_v27 = vld [vmem:[#allocation6 + $0x20] sm:$0xff]  ;;  %v59_v28 = vld [vmem:[#allocation6 + $0x18] sm:$0xff] }
  0x26   :  { %129 = vmatpush1.msra.mxu0 %v78_v9  ;;  %270 = vmatpush1.msra.mxu1 %v78_v9  ;;  %v58_v29 = vld [vmem:[#allocation6 + $0x10] sm:$0xff]  ;;  %v57_v30 = vld [vmem:[#allocation6 + $0x8] sm:$0xff]  ;;  %v56_v31 = vld [vmem:[#allocation6] sm:$0xff] }
  0x27   :  { %130 = vmatprep.subr.mxu0 %v77_v10  ;;  %239 = vmatprep.subr.mxu1 %v77_v10  ;;  %v119_v32 = vld [vmem:[#allocation6 + $0x1f8] sm:$0xff]  ;;  %v118_v33 = vld [vmem:[#allocation6 + $0x1f0] sm:$0xff]  ;;  %v117_v34 = vld [vmem:[#allocation6 + $0x1e8] sm:$0xff] }
  0x28   :  { %131 = vmatpush1.msra.mxu0 %v76_v11  ;;  %271 = vmatpush1.msra.mxu1 %v76_v11  ;;  %v116_v35 = vld [vmem:[#allocation6 + $0x1e0] sm:$0xff]  ;;  %v115_v36 = vld [vmem:[#allocation6 + $0x1d8] sm:$0xff]  ;;  %v114_v37 = vld [vmem:[#allocation6 + $0x1d0] sm:$0xff] }
  0x29   :  { %132 = vmatprep.subr.mxu0 %v75_v12  ;;  %240 = vmatprep.subr.mxu1 %v75_v12  ;;  %v113_v38 = vld [vmem:[#allocation6 + $0x1c8] sm:$0xff]  ;;  %v112_v39 = vld [vmem:[#allocation6 + $0x1c0] sm:$0xff]  ;;  %v111_v40 = vld [vmem:[#allocation6 + $0x1b8] sm:$0xff] }
  0x2a   :  { %133 = vmatpush1.msra.mxu0 %v74_v13  ;;  %272 = vmatpush1.msra.mxu1 %v74_v13  ;;  %v110_v41 = vld [vmem:[#allocation6 + $0x1b0] sm:$0xff]  ;;  %v109_v42 = vld [vmem:[#allocation6 + $0x1a8] sm:$0xff]  ;;  %v108_v43 = vld [vmem:[#allocation6 + $0x1a0] sm:$0xff] }
  0x2b   :  { %134 = vmatprep.subr.mxu0 %v73_v14  ;;  %241 = vmatprep.subr.mxu1 %v73_v14  ;;  %v107_v44 = vld [vmem:[#allocation6 + $0x198] sm:$0xff]  ;;  %v106_v45 = vld [vmem:[#allocation6 + $0x190] sm:$0xff]  ;;  %v105_v46 = vld [vmem:[#allocation6 + $0x188] sm:$0xff] }
  0x2c   :  { %135 = vmatpush1.msra.mxu0 %v72_v15  ;;  %273 = vmatpush1.msra.mxu1 %v72_v15  ;;  %v104_v47 = vld [vmem:[#allocation6 + $0x180] sm:$0xff]  ;;  %v103_v48 = vld [vmem:[#allocation6 + $0x178] sm:$0xff]  ;;  %v102_v49 = vld [vmem:[#allocation6 + $0x170] sm:$0xff] }
  0x2d   :  { %136 = vmatprep.subr.mxu0 %v71_v16  ;;  %242 = vmatprep.subr.mxu1 %v71_v16  ;;  %v101_v50 = vld [vmem:[#allocation6 + $0x168] sm:$0xff]  ;;  %v100_v51 = vld [vmem:[#allocation6 + $0x160] sm:$0xff]  ;;  %v99_v52 = vld [vmem:[#allocation6 + $0x158] sm:$0xff] }
  0x2e   :  { %137 = vmatpush1.msra.mxu0 %v70_v17  ;;  %274 = vmatpush1.msra.mxu1 %v70_v17  ;;  %v98_v53 = vld [vmem:[#allocation6 + $0x150] sm:$0xff]  ;;  %v97_v54 = vld [vmem:[#allocation6 + $0x148] sm:$0xff]  ;;  %v96_v55 = vld [vmem:[#allocation6 + $0x140] sm:$0xff] }
  0x2f   :  { %138 = vmatprep.subr.mxu0 %v69_v18  ;;  %243 = vmatprep.subr.mxu1 %v69_v18  ;;  %v95_v56 = vld [vmem:[#allocation6 + $0x138] sm:$0xff]  ;;  %v94_v57 = vld [vmem:[#allocation6 + $0x130] sm:$0xff]  ;;  %v93_v58 = vld [vmem:[#allocation6 + $0x128] sm:$0xff] }
  0x30   :  { %139 = vmatpush1.msra.mxu0 %v68_v19  ;;  %275 = vmatpush1.msra.mxu1 %v68_v19  ;;  %v92_v59 = vld [vmem:[#allocation6 + $0x120] sm:$0xff]  ;;  %v91_v60 = vld [vmem:[#allocation6 + $0x118] sm:$0xff]  ;;  %v90_v61 = vld [vmem:[#allocation6 + $0x110] sm:$0xff] }
  0x31   :  { %140 = vmatprep.subr.mxu0 %v67_v20  ;;  %244 = vmatprep.subr.mxu1 %v67_v20  ;;  %v89_v62 = vld [vmem:[#allocation6 + $0x108] sm:$0xff]  ;;  %v88_v63 = vld [vmem:[#allocation6 + $0x100] sm:$0xff]  ;;  %v55_v1 = vld [vmem:[#allocation3 + $0x18] sm:$0xff] }
  0x32   :  { %141 = vmatpush1.msra.mxu0 %v66_v21  ;;  %276 = vmatpush1.msra.mxu1 %v66_v21  ;;  %v53_v0 = vld [vmem:[#allocation3 + $0x8] sm:$0xff]  ;;  %v52_v2 = vld [vmem:[#allocation3] sm:$0xff]  ;;  %v54_v3 = vld [vmem:[#allocation3 + $0x10] sm:$0xff] }
  0x33   :  { %142 = vmatprep.subr.mxu0 %v65_v22  ;;  %245 = vmatprep.subr.mxu1 %v65_v22 }
  0x34   :  { %143 = vmatpush1.msra.mxu0 %v64_v23  ;;  %277 = vmatpush1.msra.mxu1 %v64_v23 }
  0x35   :  { %144 = vmatprep.subr.mxu0 %v63_v24  ;;  %246 = vmatprep.subr.mxu1 %v63_v24 }
  0x36   :  { %145 = vmatpush1.msra.mxu0 %v62_v25  ;;  %278 = vmatpush1.msra.mxu1 %v62_v25 }
  0x37   :  { %146 = vmatprep.subr.mxu0 %v61_v26  ;;  %247 = vmatprep.subr.mxu1 %v61_v26 }
  0x38   :  { %147 = vmatpush1.msra.mxu0 %v60_v27  ;;  %279 = vmatpush1.msra.mxu1 %v60_v27 }
  0x39   :  { %148 = vmatprep.subr.mxu0 %v59_v28  ;;  %248 = vmatprep.subr.mxu1 %v59_v28 }
  0x3a   :  { %149 = vmatpush1.msra.mxu0 %v58_v29  ;;  %280 = vmatpush1.msra.mxu1 %v58_v29 }
  0x3b   :  { %150 = vmatprep.subr.mxu0 %v57_v30  ;;  %249 = vmatprep.subr.mxu1 %v57_v30 }
  0x3c   :  { %151 = vmatpush1.msra.mxu0 %v56_v31  ;;  %281 = vmatpush1.msra.mxu1 %v56_v31 }
  0x3d   :  { %152 = vmatprep.subr.mxu0 %v119_v32  ;;  %250 = vmatprep.subr.mxu1 %v119_v32 }
  0x3e   :  { %153 = vmatpush2.msra.mxu0 %v118_v33  ;;  %282 = vmatpush2.msra.mxu1 %v118_v33 }
  0x3f   :  { %154 = vmatprep.subr.mxu0 %v117_v34  ;;  %251 = vmatprep.subr.mxu1 %v117_v34 }
  0x40   :  { %155 = vmatpush2.msra.mxu0 %v116_v35  ;;  %283 = vmatpush2.msra.mxu1 %v116_v35 }
  0x41   :  { %156 = vmatprep.subr.mxu0 %v115_v36  ;;  %252 = vmatprep.subr.mxu1 %v115_v36 }
  0x42   :  { %157 = vmatpush2.msra.mxu0 %v114_v37  ;;  %284 = vmatpush2.msra.mxu1 %v114_v37 }
  0x43   :  { %158 = vmatprep.subr.mxu0 %v113_v38  ;;  %253 = vmatprep.subr.mxu1 %v113_v38 }
  0x44   :  { %159 = vmatpush2.msra.mxu0 %v112_v39  ;;  %285 = vmatpush2.msra.mxu1 %v112_v39 }
  0x45   :  { %160 = vmatprep.subr.mxu0 %v111_v40  ;;  %254 = vmatprep.subr.mxu1 %v111_v40 }
  0x46   :  { %161 = vmatpush2.msra.mxu0 %v110_v41  ;;  %286 = vmatpush2.msra.mxu1 %v110_v41 }
  0x47   :  { %162 = vmatprep.subr.mxu0 %v109_v42  ;;  %255 = vmatprep.subr.mxu1 %v109_v42 }
  0x48   :  { %163 = vmatpush2.msra.mxu0 %v108_v43  ;;  %287 = vmatpush2.msra.mxu1 %v108_v43 }
  0x49   :  { %164 = vmatprep.subr.mxu0 %v107_v44  ;;  %256 = vmatprep.subr.mxu1 %v107_v44 }
  0x4a   :  { %165 = vmatpush2.msra.mxu0 %v106_v45  ;;  %288 = vmatpush2.msra.mxu1 %v106_v45 }
  0x4b   :  { %166 = vmatprep.subr.mxu0 %v105_v46  ;;  %257 = vmatprep.subr.mxu1 %v105_v46 }
  0x4c   :  { %167 = vmatpush2.msra.mxu0 %v104_v47  ;;  %289 = vmatpush2.msra.mxu1 %v104_v47 }
  0x4d   :  { %168 = vmatprep.subr.mxu0 %v103_v48  ;;  %258 = vmatprep.subr.mxu1 %v103_v48 }
  0x4e   :  { %169 = vmatpush2.msra.mxu0 %v102_v49  ;;  %290 = vmatpush2.msra.mxu1 %v102_v49 }
  0x4f   :  { %170 = vmatprep.subr.mxu0 %v101_v50  ;;  %259 = vmatprep.subr.mxu1 %v101_v50 }
  0x50   :  { %171 = vmatpush2.msra.mxu0 %v100_v51  ;;  %291 = vmatpush2.msra.mxu1 %v100_v51 }
  0x51   :  { %172 = vmatprep.subr.mxu0 %v99_v52  ;;  %260 = vmatprep.subr.mxu1 %v99_v52 }
  0x52   :  { %173 = vmatpush2.msra.mxu0 %v98_v53  ;;  %292 = vmatpush2.msra.mxu1 %v98_v53 }
  0x53   :  { %174 = vmatprep.subr.mxu0 %v97_v54  ;;  %261 = vmatprep.subr.mxu1 %v97_v54 }
  0x54   :  { %175 = vmatpush2.msra.mxu0 %v96_v55  ;;  %293 = vmatpush2.msra.mxu1 %v96_v55 }
  0x55   :  { %176 = vmatprep.subr.mxu0 %v95_v56  ;;  %262 = vmatprep.subr.mxu1 %v95_v56 }
  0x56   :  { %177 = vmatpush2.msra.mxu0 %v94_v57  ;;  %294 = vmatpush2.msra.mxu1 %v94_v57 }
  0x57   :  { %178 = vmatprep.subr.mxu0 %v93_v58  ;;  %263 = vmatprep.subr.mxu1 %v93_v58 }
  0x58   :  { %179 = vmatpush2.msra.mxu0 %v92_v59  ;;  %295 = vmatpush2.msra.mxu1 %v92_v59 }
  0x59   :  { %180 = vmatprep.subr.mxu0 %v91_v60  ;;  %264 = vmatprep.subr.mxu1 %v91_v60 }
  0x5a   :  { %181 = vmatpush2.msra.mxu0 %v90_v61  ;;  %296 = vmatpush2.msra.mxu1 %v90_v61 }
  0x5b   :  { %182 = vmatprep.subr.mxu0 %v89_v62  ;;  %265 = vmatprep.subr.mxu1 %v89_v62 }
  0x5c   :  { %183 = vmatpush2.msra.mxu0 %v88_v63  ;;  %297 = vmatpush2.msra.mxu1 %v88_v63 }
  0x5d   :  { %184 = vmatprep.mubr.f32.mxu0 %v53_v0  ;;  %190 = vmatprep.mubr.f32.mxu1 %v55_v1 }
  0x5e   :  { %185 = vmatmul.mubr.f32.vlgmr.msra.gmra.mxu0 %v52_v2  ;;  %191 = vmatmul.mubr.f32.vlgmr.msra.gmra.mxu1 %v54_v3 }
 0x11e   :  { %v186_v4 = vpop.f32.mrf.mxu0  ;;  %v192_v5 = vpop.f32.mrf.mxu1 }
 0x11f   :  { %212 = vst [vmem:[#allocation8] sm:$0xff] %v186_v4  ;;  %214 = vst [vmem:[#allocation8 + $0x10] sm:$0xff] %v192_v5 }
 0x120   :  { %v188_v6 = vpop.f32.mrf.mxu0  ;;  %v194_v7 = vpop.f32.mrf.mxu1 }
 0x121   :  { %213 = vst [vmem:[#allocation8 + $0x8] sm:$0xff] %v188_v6  ;;  %215 = vst [vmem:[#allocation8 + $0x18] sm:$0xff] %v194_v7 }
 0x122   :  { %354 = shalt.err (!%p351_p0)
}
 0x123   :  { %227 = dma.vmem_to_hbm [thread:$0]  %s222_s1, 512, %s409_s2, [#allocation5], %s370_s12, %s370_s12, %s371_s13  }
 0x124   :  { %367 = dma.done.wait [#allocation5], 512  }
 0x125   :  { %368 = vsyncadd [#allocation5], 4294966784 }
 0x126   :  { %231 = vsyncpa [#allocation4], 1 }
 0x127   :  { %232 = vsyncpa [#allocation7], 1 }
 0x128   :  { %233 = vsyncpa [#allocation5], 1 }

</bundles_post_ra>
